<compile_context>
chip_gen: v6e
topology: v6e:2x2x1
jax: 0.10.0
libtpu: 0.0.40
codegen_flags: <defaults>
</compile_context>

<pallas_src>
import functools

import jax
import jax.numpy as jnp
from jax import lax
from jax.experimental import pallas as pl
from jax.experimental.pallas import tpu as pltpu


# ---------------------------------------------------------------------------
# Kernel
# ---------------------------------------------------------------------------

def _shift_rows_zero(p, dy, H):
    """Return s with s[h] = p[h + dy], zero outside [0, H).  Static dy."""
    if dy == 0:
        return p
    shifted = pltpu.roll(p, shift=(-dy) % H, axis=0)   # XLU sublane rotate
    rows = lax.broadcasted_iota(jnp.int32, p.shape, 0)
    valid = jnp.logical_and(rows + dy >= 0, rows + dy < H)
    return jnp.where(valid, shifted, jnp.zeros_like(shifted))


def _conv_bn_relu(x2d, w_ref, s_ref, b_ref, H):
    """(conv3x3 pad=1 no-bias) -> folded BN -> ReLU, width folded into lanes.

    x2d  : (H, W*C_in)  bf16 activations
    w_ref: (3, W*C_in, W*C_out) bf16 banded weights (one matrix per kernel row)
    s/b  : (1, W*C_out) f32 folded BatchNorm scale / shift
    """
    acc = jnp.zeros((H, w_ref.shape[-1]), jnp.float32)
    for ky in range(3):                                       # 3 lane-dense MXU dots
        p = jnp.dot(x2d, w_ref[ky], preferred_element_type=jnp.float32)
        acc = acc + _shift_rows_zero(p, ky - 1, H)
    return jnp.maximum(acc * s_ref[...] + b_ref[...], 0.0)    # f32 epilogue


def _double_conv_kernel(x_ref, w1_ref, s1_ref, b1_ref, w2_ref, s2_ref, b2_ref,
                        o_ref, *, H):
    x2d = x_ref[0]                                            # (H, W*C_in) bf16
    y1 = _conv_bn_relu(x2d, w1_ref, s1_ref, b1_ref, H)        # f32 (H, W*C_mid)
    y2 = _conv_bn_relu(y1.astype(jnp.bfloat16), w2_ref, s2_ref, b2_ref, H)
    o_ref[0] = y2.astype(o_ref.dtype)                         # lane-dense store


# ---------------------------------------------------------------------------
# Wrapper
# ---------------------------------------------------------------------------

def _fold_bn(gamma, beta, mean, var, eps):
    scale = gamma / jnp.sqrt(var + eps)
    shift = beta - mean * scale
    return scale.astype(jnp.float32), shift.astype(jnp.float32)


def _banded_weights(w_hwio, width):
    """(3, 3, Cin, Cout) HWIO -> (3, width*Cin, width*Cout) f32.

    M[ky][(w+dx-1)*Cin + ci, w*Cout + co] = w_hwio[ky, dx, ci, co]
    (entries with w+dx-1 outside [0, width) are simply absent => zero padding
    along the width axis is absorbed into the weight matrix).
    """
    mats = []
    for ky in range(3):
        m = sum(jnp.kron(jnp.eye(width, k=1 - dx, dtype=jnp.float32),
                         w_hwio[ky, dx].astype(jnp.float32))
                for dx in range(3))
        mats.append(m)
    return jnp.stack(mats)


def double_conv_forward(x, w1, bn1, w2, bn2, *, eps=1e-5):
    """DoubleConv forward (eval-mode BN).

    x  : (B, H, W, C_in) NHWC float32   (PyTorch NCHW callers: transpose first)
    w1 : (3, 3, C_in, C_mid) HWIO       w2 : (3, 3, C_mid, C_out) HWIO
    bn1/bn2 : (gamma, beta, running_mean, running_var) per-channel vectors
    """
    B, H, W, C_in = x.shape
    C_mid, C_out = w1.shape[-1], w2.shape[-1]

    s1, b1 = _fold_bn(*bn1, eps)
    s2, b2 = _fold_bn(*bn2, eps)
    # Tile per-channel BN params across W to match the (H, W*C) lane layout.
    s1t = jnp.tile(s1, W).reshape(1, W * C_mid)
    b1t = jnp.tile(b1, W).reshape(1, W * C_mid)
    s2t = jnp.tile(s2, W).reshape(1, W * C_out)
    b2t = jnp.tile(b2, W).reshape(1, W * C_out)

    w1b = _banded_weights(w1, W).astype(jnp.bfloat16)   # (3, W*C_in,  W*C_mid)
    w2b = _banded_weights(w2, W).astype(jnp.bfloat16)   # (3, W*C_mid, W*C_out)

    # Channels-last with width folded into the lane axis; bf16 into the MXU.
    x2d = x.reshape(B, H, W * C_in).astype(jnp.bfloat16)

    kernel = functools.partial(_double_conv_kernel, H=H)

    flops = 2 * B * H * W * 9 * (C_in * C_mid + C_mid * C_out)
    bytes_accessed = (x2d.size * 2 + w1b.size * 2 + w2b.size * 2
                      + (s1t.size + b1t.size + s2t.size + b2t.size) * 4
                      + B * H * W * C_out * 4)

    out2d = pl.pallas_call(
        kernel,
        out_shape=jax.ShapeDtypeStruct((B, H, W * C_out), jnp.float32),
        grid=(B,),
        in_specs=[
            pl.BlockSpec((1, H, W * C_in), lambda b: (b, 0, 0)),
            pl.BlockSpec((3, W * C_in, W * C_mid), lambda b: (0, 0, 0)),
            pl.BlockSpec((1, W * C_mid), lambda b: (0, 0)),
            pl.BlockSpec((1, W * C_mid), lambda b: (0, 0)),
            pl.BlockSpec((3, W * C_mid, W * C_out), lambda b: (0, 0, 0)),
            pl.BlockSpec((1, W * C_out), lambda b: (0, 0)),
            pl.BlockSpec((1, W * C_out), lambda b: (0, 0)),
        ],
        out_specs=pl.BlockSpec((1, H, W * C_out), lambda b: (b, 0, 0)),
        compiler_params=pltpu.CompilerParams(
            dimension_semantics=("parallel",),
            vmem_limit_bytes=32 * 1024 * 1024),
        cost_estimate=pl.CostEstimate(flops=flops, transcendentals=0,
                                      bytes_accessed=bytes_accessed),
    )(x2d, w1b, s1t, b1t, w2b, s2t, b2t)

    return out2d.reshape(B, H, W, C_out)


# ---------------------------------------------------------------------------
# Pure-JAX reference (PyTorch eval-mode semantics, f32)
# ---------------------------------------------------------------------------

def reference_double_conv(x, w1, bn1, w2, bn2, *, eps=1e-5):
    def block(z, w, params):
        gamma, beta, mean, var = params
        y = lax.conv_general_dilated(
            z, w, window_strides=(1, 1), padding="SAME",
            dimension_numbers=("NHWC", "HWIO", "NHWC"))
        y = (y - mean) * (gamma / jnp.sqrt(var + eps)) + beta
        return jnp.maximum(y, 0.0)
    return block(block(x, w1, bn1), w2, bn2)


# ---------------------------------------------------------------------------
# Demo
# ---------------------------------------------------------------------------

if __name__ == "__main__":
    B, H, W = 2, 16, 16
    C_in, C_mid, C_out = 4, 8, 8

    key = jax.random.PRNGKey(0)
    ks = jax.random.split(key, 11)
    x = jax.random.normal(ks[0], (B, H, W, C_in), jnp.float32)
    w1 = 0.1 * jax.random.normal(ks[1], (3, 3, C_in, C_mid), jnp.float32)
    w2 = 0.1 * jax.random.normal(ks[2], (3, 3, C_mid, C_out), jnp.float32)
    bn1 = (jax.random.uniform(ks[3], (C_mid,), jnp.float32, 0.5, 1.5),   # gamma
           0.1 * jax.random.normal(ks[4], (C_mid,), jnp.float32),        # beta
           0.1 * jax.random.normal(ks[5], (C_mid,), jnp.float32),        # mean
           jax.random.uniform(ks[6], (C_mid,), jnp.float32, 0.5, 1.5))   # var
    bn2 = (jax.random.uniform(ks[7], (C_out,), jnp.float32, 0.5, 1.5),
           0.1 * jax.random.normal(ks[8], (C_out,), jnp.float32),
           0.1 * jax.random.normal(ks[9], (C_out,), jnp.float32),
           jax.random.uniform(ks[10], (C_out,), jnp.float32, 0.5, 1.5))

    y = double_conv_forward(x, w1, bn1, w2, bn2)
    y = jax.block_until_ready(y)

    y_ref = reference_double_conv(x, w1, bn1, w2, bn2)
    assert y.shape == (B, H, W, C_out)
    # bf16 activations/weights in the kernel vs f32 reference -> relaxed tol.
    assert jnp.allclose(y, y_ref, atol=5e-2, rtol=5e-2), "mismatch vs reference"

    print("KERNEL_OK")
</pallas_src>

<mosaic_0001>
module attributes {stable_mosaic.version = 11 : i64} {
  func.func @_double_conv_kernel(%arg0: i32, %arg1: memref<1x16x64xbf16, #tpu.memory_space<vmem>>, %arg2: memref<3x64x128xbf16, #tpu.memory_space<vmem>>, %arg3: memref<1x128xf32, #tpu.memory_space<vmem>>, %arg4: memref<1x128xf32, #tpu.memory_space<vmem>>, %arg5: memref<3x128x128xbf16, #tpu.memory_space<vmem>>, %arg6: memref<1x128xf32, #tpu.memory_space<vmem>>, %arg7: memref<1x128xf32, #tpu.memory_space<vmem>>, %arg8: memref<1x16x128xf32, #tpu.memory_space<vmem>>) attributes {dimension_semantics = [#tpu.dimension_semantics<parallel>], iteration_bounds = array<i64: 2>, scalar_prefetch = 0 : i64, scratch_operands = 0 : i64, tpu.core_type = #tpu.core_type<tc>, window_params = [{transform_indices = @transform_0, window_bounds = array<i64: 1, 16, 64>}, {pipeline_mode = #tpu.pipeline_mode<synchronous>, transform_indices = @transform_1, window_bounds = array<i64: 3, 64, 128>}, {pipeline_mode = #tpu.pipeline_mode<synchronous>, transform_indices = @transform_2, window_bounds = array<i64: 1, 128>}, {pipeline_mode = #tpu.pipeline_mode<synchronous>, transform_indices = @transform_3, window_bounds = array<i64: 1, 128>}, {pipeline_mode = #tpu.pipeline_mode<synchronous>, transform_indices = @transform_4, window_bounds = array<i64: 3, 128, 128>}, {pipeline_mode = #tpu.pipeline_mode<synchronous>, transform_indices = @transform_5, window_bounds = array<i64: 1, 128>}, {pipeline_mode = #tpu.pipeline_mode<synchronous>, transform_indices = @transform_6, window_bounds = array<i64: 1, 128>}, {transform_indices = @transform_7, window_bounds = array<i64: 1, 16, 128>}]} {
    %c0 = arith.constant 0 : index
    %c0_0 = arith.constant 0 : index
    %c0_1 = arith.constant 0 : index
    %0 = vector.load %arg1[%c0, %c0_0, %c0_1] : memref<1x16x64xbf16, #tpu.memory_space<vmem>>, vector<1x16x64xbf16>
    %1 = vector.shape_cast %0 : vector<1x16x64xbf16> to vector<16x64xbf16>
    %cst = arith.constant 0.000000e+00 : f32
    %2 = vector.broadcast %cst : f32 to vector<16x128xf32>
    %c0_2 = arith.constant 0 : index
    %c0_3 = arith.constant 0 : index
    %c0_4 = arith.constant 0 : index
    %3 = vector.load %arg2[%c0_2, %c0_3, %c0_4] : memref<3x64x128xbf16, #tpu.memory_space<vmem>>, vector<1x64x128xbf16>
    %4 = vector.shape_cast %3 : vector<1x64x128xbf16> to vector<64x128xbf16>
    %cst_5 = arith.constant dense<0.000000e+00> : vector<16x128xf32>
    %5 = tpu.matmul %1, %4, %cst_5 {dimension_numbers = #tpu.dot_dimension_numbers<[1], [0], [0], [1], [0, 0, 1, 1], [], []>} : vector<16x64xbf16>, vector<64x128xbf16>, vector<16x128xf32> -> vector<16x128xf32>
    %c1_i32 = arith.constant 1 : i32
    %6 = tpu.dynamic_rotate %5 by %c1_i32 dim 0 : vector<16x128xf32>, i32 -> vector<16x128xf32>
    %7 = tpu.iota {dimensions = array<i32: 0>} : vector<16x128xi32>
    %c-1_i32 = arith.constant -1 : i32
    %8 = vector.broadcast %c-1_i32 : i32 to vector<16x128xi32>
    %9 = arith.addi %7, %8 : vector<16x128xi32>
    %c0_i32 = arith.constant 0 : i32
    %10 = vector.broadcast %c0_i32 : i32 to vector<16x128xi32>
    %11 = arith.cmpi sge, %9, %10 : vector<16x128xi32>
    %c-1_i32_6 = arith.constant -1 : i32
    %12 = vector.broadcast %c-1_i32_6 : i32 to vector<16x128xi32>
    %13 = arith.addi %7, %12 : vector<16x128xi32>
    %c16_i32 = arith.constant 16 : i32
    %14 = vector.broadcast %c16_i32 : i32 to vector<16x128xi32>
    %15 = arith.cmpi slt, %13, %14 : vector<16x128xi32>
    %16 = arith.andi %11, %15 : vector<16x128xi1>
    %cst_7 = arith.constant 0.000000e+00 : f32
    %17 = vector.broadcast %cst_7 : f32 to vector<16x128xf32>
    %18 = arith.select %16, %6, %17 : vector<16x128xi1>, vector<16x128xf32>
    %19 = arith.addf %2, %18 : vector<16x128xf32>
    %c1 = arith.constant 1 : index
    %c0_8 = arith.constant 0 : index
    %c0_9 = arith.constant 0 : index
    %20 = vector.load %arg2[%c1, %c0_8, %c0_9] : memref<3x64x128xbf16, #tpu.memory_space<vmem>>, vector<1x64x128xbf16>
    %21 = vector.shape_cast %20 : vector<1x64x128xbf16> to vector<64x128xbf16>
    %cst_10 = arith.constant dense<0.000000e+00> : vector<16x128xf32>
    %22 = tpu.matmul %1, %21, %cst_10 {dimension_numbers = #tpu.dot_dimension_numbers<[1], [0], [0], [1], [0, 0, 1, 1], [], []>} : vector<16x64xbf16>, vector<64x128xbf16>, vector<16x128xf32> -> vector<16x128xf32>
    %23 = arith.addf %19, %22 : vector<16x128xf32>
    %c2 = arith.constant 2 : index
    %c0_11 = arith.constant 0 : index
    %c0_12 = arith.constant 0 : index
    %24 = vector.load %arg2[%c2, %c0_11, %c0_12] : memref<3x64x128xbf16, #tpu.memory_space<vmem>>, vector<1x64x128xbf16>
    %25 = vector.shape_cast %24 : vector<1x64x128xbf16> to vector<64x128xbf16>
    %cst_13 = arith.constant dense<0.000000e+00> : vector<16x128xf32>
    %26 = tpu.matmul %1, %25, %cst_13 {dimension_numbers = #tpu.dot_dimension_numbers<[1], [0], [0], [1], [0, 0, 1, 1], [], []>} : vector<16x64xbf16>, vector<64x128xbf16>, vector<16x128xf32> -> vector<16x128xf32>
    %c15_i32 = arith.constant 15 : i32
    %27 = tpu.dynamic_rotate %26 by %c15_i32 dim 0 : vector<16x128xf32>, i32 -> vector<16x128xf32>
    %28 = tpu.iota {dimensions = array<i32: 0>} : vector<16x128xi32>
    %c1_i32_14 = arith.constant 1 : i32
    %29 = vector.broadcast %c1_i32_14 : i32 to vector<16x128xi32>
    %30 = arith.addi %28, %29 : vector<16x128xi32>
    %c0_i32_15 = arith.constant 0 : i32
    %31 = vector.broadcast %c0_i32_15 : i32 to vector<16x128xi32>
    %32 = arith.cmpi sge, %30, %31 : vector<16x128xi32>
    %c1_i32_16 = arith.constant 1 : i32
    %33 = vector.broadcast %c1_i32_16 : i32 to vector<16x128xi32>
    %34 = arith.addi %28, %33 : vector<16x128xi32>
    %c16_i32_17 = arith.constant 16 : i32
    %35 = vector.broadcast %c16_i32_17 : i32 to vector<16x128xi32>
    %36 = arith.cmpi slt, %34, %35 : vector<16x128xi32>
    %37 = arith.andi %32, %36 : vector<16x128xi1>
    %cst_18 = arith.constant 0.000000e+00 : f32
    %38 = vector.broadcast %cst_18 : f32 to vector<16x128xf32>
    %39 = arith.select %37, %27, %38 : vector<16x128xi1>, vector<16x128xf32>
    %40 = arith.addf %23, %39 : vector<16x128xf32>
    %c0_19 = arith.constant 0 : index
    %c0_20 = arith.constant 0 : index
    %41 = vector.load %arg3[%c0_19, %c0_20] : memref<1x128xf32, #tpu.memory_space<vmem>>, vector<1x128xf32>
    %42 = vector.broadcast %41 : vector<1x128xf32> to vector<16x128xf32>
    %43 = arith.mulf %40, %42 : vector<16x128xf32>
    %c0_21 = arith.constant 0 : index
    %c0_22 = arith.constant 0 : index
    %44 = vector.load %arg4[%c0_21, %c0_22] : memref<1x128xf32, #tpu.memory_space<vmem>>, vector<1x128xf32>
    %45 = vector.broadcast %44 : vector<1x128xf32> to vector<16x128xf32>
    %46 = arith.addf %43, %45 : vector<16x128xf32>
    %cst_23 = arith.constant 0.000000e+00 : f32
    %47 = vector.broadcast %cst_23 : f32 to vector<16x128xf32>
    %48 = arith.maximumf %46, %47 : vector<16x128xf32>
    %49 = arith.truncf %48 : vector<16x128xf32> to vector<16x128xbf16>
    %cst_24 = arith.constant 0.000000e+00 : f32
    %50 = vector.broadcast %cst_24 : f32 to vector<16x128xf32>
    %c0_25 = arith.constant 0 : index
    %c0_26 = arith.constant 0 : index
    %c0_27 = arith.constant 0 : index
    %51 = vector.load %arg5[%c0_25, %c0_26, %c0_27] : memref<3x128x128xbf16, #tpu.memory_space<vmem>>, vector<1x128x128xbf16>
    %52 = vector.shape_cast %51 : vector<1x128x128xbf16> to vector<128x128xbf16>
    %cst_28 = arith.constant dense<0.000000e+00> : vector<16x128xf32>
    %53 = tpu.matmul %49, %52, %cst_28 {dimension_numbers = #tpu.dot_dimension_numbers<[1], [0], [0], [1], [0, 0, 1, 1], [], []>} : vector<16x128xbf16>, vector<128x128xbf16>, vector<16x128xf32> -> vector<16x128xf32>
    %c1_i32_29 = arith.constant 1 : i32
    %54 = tpu.dynamic_rotate %53 by %c1_i32_29 dim 0 : vector<16x128xf32>, i32 -> vector<16x128xf32>
    %55 = tpu.iota {dimensions = array<i32: 0>} : vector<16x128xi32>
    %c-1_i32_30 = arith.constant -1 : i32
    %56 = vector.broadcast %c-1_i32_30 : i32 to vector<16x128xi32>
    %57 = arith.addi %55, %56 : vector<16x128xi32>
    %c0_i32_31 = arith.constant 0 : i32
    %58 = vector.broadcast %c0_i32_31 : i32 to vector<16x128xi32>
    %59 = arith.cmpi sge, %57, %58 : vector<16x128xi32>
    %c-1_i32_32 = arith.constant -1 : i32
    %60 = vector.broadcast %c-1_i32_32 : i32 to vector<16x128xi32>
    %61 = arith.addi %55, %60 : vector<16x128xi32>
    %c16_i32_33 = arith.constant 16 : i32
    %62 = vector.broadcast %c16_i32_33 : i32 to vector<16x128xi32>
    %63 = arith.cmpi slt, %61, %62 : vector<16x128xi32>
    %64 = arith.andi %59, %63 : vector<16x128xi1>
    %cst_34 = arith.constant 0.000000e+00 : f32
    %65 = vector.broadcast %cst_34 : f32 to vector<16x128xf32>
    %66 = arith.select %64, %54, %65 : vector<16x128xi1>, vector<16x128xf32>
    %67 = arith.addf %50, %66 : vector<16x128xf32>
    %c1_35 = arith.constant 1 : index
    %c0_36 = arith.constant 0 : index
    %c0_37 = arith.constant 0 : index
    %68 = vector.load %arg5[%c1_35, %c0_36, %c0_37] : memref<3x128x128xbf16, #tpu.memory_space<vmem>>, vector<1x128x128xbf16>
    %69 = vector.shape_cast %68 : vector<1x128x128xbf16> to vector<128x128xbf16>
    %cst_38 = arith.constant dense<0.000000e+00> : vector<16x128xf32>
    %70 = tpu.matmul %49, %69, %cst_38 {dimension_numbers = #tpu.dot_dimension_numbers<[1], [0], [0], [1], [0, 0, 1, 1], [], []>} : vector<16x128xbf16>, vector<128x128xbf16>, vector<16x128xf32> -> vector<16x128xf32>
    %71 = arith.addf %67, %70 : vector<16x128xf32>
    %c2_39 = arith.constant 2 : index
    %c0_40 = arith.constant 0 : index
    %c0_41 = arith.constant 0 : index
    %72 = vector.load %arg5[%c2_39, %c0_40, %c0_41] : memref<3x128x128xbf16, #tpu.memory_space<vmem>>, vector<1x128x128xbf16>
    %73 = vector.shape_cast %72 : vector<1x128x128xbf16> to vector<128x128xbf16>
    %cst_42 = arith.constant dense<0.000000e+00> : vector<16x128xf32>
    %74 = tpu.matmul %49, %73, %cst_42 {dimension_numbers = #tpu.dot_dimension_numbers<[1], [0], [0], [1], [0, 0, 1, 1], [], []>} : vector<16x128xbf16>, vector<128x128xbf16>, vector<16x128xf32> -> vector<16x128xf32>
    %c15_i32_43 = arith.constant 15 : i32
    %75 = tpu.dynamic_rotate %74 by %c15_i32_43 dim 0 : vector<16x128xf32>, i32 -> vector<16x128xf32>
    %76 = tpu.iota {dimensions = array<i32: 0>} : vector<16x128xi32>
    %c1_i32_44 = arith.constant 1 : i32
    %77 = vector.broadcast %c1_i32_44 : i32 to vector<16x128xi32>
    %78 = arith.addi %76, %77 : vector<16x128xi32>
    %c0_i32_45 = arith.constant 0 : i32
    %79 = vector.broadcast %c0_i32_45 : i32 to vector<16x128xi32>
    %80 = arith.cmpi sge, %78, %79 : vector<16x128xi32>
    %c1_i32_46 = arith.constant 1 : i32
    %81 = vector.broadcast %c1_i32_46 : i32 to vector<16x128xi32>
    %82 = arith.addi %76, %81 : vector<16x128xi32>
    %c16_i32_47 = arith.constant 16 : i32
    %83 = vector.broadcast %c16_i32_47 : i32 to vector<16x128xi32>
    %84 = arith.cmpi slt, %82, %83 : vector<16x128xi32>
    %85 = arith.andi %80, %84 : vector<16x128xi1>
    %cst_48 = arith.constant 0.000000e+00 : f32
    %86 = vector.broadcast %cst_48 : f32 to vector<16x128xf32>
    %87 = arith.select %85, %75, %86 : vector<16x128xi1>, vector<16x128xf32>
    %88 = arith.addf %71, %87 : vector<16x128xf32>
    %c0_49 = arith.constant 0 : index
    %c0_50 = arith.constant 0 : index
    %89 = vector.load %arg6[%c0_49, %c0_50] : memref<1x128xf32, #tpu.memory_space<vmem>>, vector<1x128xf32>
    %90 = vector.broadcast %89 : vector<1x128xf32> to vector<16x128xf32>
    %91 = arith.mulf %88, %90 : vector<16x128xf32>
    %c0_51 = arith.constant 0 : index
    %c0_52 = arith.constant 0 : index
    %92 = vector.load %arg7[%c0_51, %c0_52] : memref<1x128xf32, #tpu.memory_space<vmem>>, vector<1x128xf32>
    %93 = vector.broadcast %92 : vector<1x128xf32> to vector<16x128xf32>
    %94 = arith.addf %91, %93 : vector<16x128xf32>
    %cst_53 = arith.constant 0.000000e+00 : f32
    %95 = vector.broadcast %cst_53 : f32 to vector<16x128xf32>
    %96 = arith.maximumf %94, %95 : vector<16x128xf32>
    %c0_54 = arith.constant 0 : index
    %c0_55 = arith.constant 0 : index
    %c0_56 = arith.constant 0 : index
    %97 = vector.load %arg8[%c0_54, %c0_55, %c0_56] : memref<1x16x128xf32, #tpu.memory_space<vmem>>, vector<1x16x128xf32>
    %98 = vector.shape_cast %97 : vector<1x16x128xf32> to vector<16x128xf32>
    %99 = vector.shape_cast %96 : vector<16x128xf32> to vector<1x16x128xf32>
    tpu.vector_store %arg8[%c0_54, %c0_55, %c0_56], %99 {strides = array<i32>} : memref<1x16x128xf32, #tpu.memory_space<vmem>>, vector<1x16x128xf32>,
    return
  }
  func.func @transform_0(%arg0: i32) -> (i32, i32, i32) {
    %c0_i32 = arith.constant 0 : i32
    %c0_i32_0 = arith.constant 0 : i32
    %c0_i32_1 = arith.constant 0 : i32
    return %arg0, %c0_i32, %c0_i32_0 : i32, i32, i32
  }
  func.func @transform_1(%arg0: i32) -> (i32, i32, i32) {
    %c0_i32 = arith.constant 0 : i32
    %c0_i32_0 = arith.constant 0 : i32
    %c0_i32_1 = arith.constant 0 : i32
    %c0_i32_2 = arith.constant 0 : i32
    return %c0_i32, %c0_i32_0, %c0_i32_1 : i32, i32, i32
  }
  func.func @transform_2(%arg0: i32) -> (i32, i32) {
    %c0_i32 = arith.constant 0 : i32
    %c0_i32_0 = arith.constant 0 : i32
    %c0_i32_1 = arith.constant 0 : i32
    return %c0_i32, %c0_i32_0 : i32, i32
  }
  func.func @transform_3(%arg0: i32) -> (i32, i32) {
    %c0_i32 = arith.constant 0 : i32
    %c0_i32_0 = arith.constant 0 : i32
    %c0_i32_1 = arith.constant 0 : i32
    return %c0_i32, %c0_i32_0 : i32, i32
  }
  func.func @transform_4(%arg0: i32) -> (i32, i32, i32) {
    %c0_i32 = arith.constant 0 : i32
    %c0_i32_0 = arith.constant 0 : i32
    %c0_i32_1 = arith.constant 0 : i32
    %c0_i32_2 = arith.constant 0 : i32
    return %c0_i32, %c0_i32_0, %c0_i32_1 : i32, i32, i32
  }
  func.func @transform_5(%arg0: i32) -> (i32, i32) {
    %c0_i32 = arith.constant 0 : i32
    %c0_i32_0 = arith.constant 0 : i32
    %c0_i32_1 = arith.constant 0 : i32
    return %c0_i32, %c0_i32_0 : i32, i32
  }
  func.func @transform_6(%arg0: i32) -> (i32, i32) {
    %c0_i32 = arith.constant 0 : i32
    %c0_i32_0 = arith.constant 0 : i32
    %c0_i32_1 = arith.constant 0 : i32
    return %c0_i32, %c0_i32_0 : i32, i32
  }
  func.func @transform_7(%arg0: i32) -> (i32, i32, i32) {
    %c0_i32 = arith.constant 0 : i32
    %c0_i32_0 = arith.constant 0 : i32
    %c0_i32_1 = arith.constant 0 : i32
    return %arg0, %c0_i32, %c0_i32_0 : i32, i32, i32
  }
}

</mosaic_0001>

<bundles_post_ra>
// kernel: tpu_custom_call.1
= control target key start
LH: loop header
LB: loop body
LE: loop exit
PB: predicated region body
PF: predicated region fallthrough
CT: control target
= control target key end

     0   :  { %s1891_s0 = inlined_call_operand.hbm [shape: bf16[2,16,64], index: 0, kind: input, shape index: {}]   ;;  %s1892_s1 = inlined_call_operand.hbm [shape: bf16[3,64,128], index: 1, kind: input, shape index: {}]   ;;  %s1893_s2 = inlined_call_operand.vmem [shape: f32[1,128], index: 2, kind: input, shape index: {}]   ;;  %s1894_s3 = inlined_call_operand.vmem [shape: f32[1,128], index: 3, kind: input, shape index: {}]   ;;  %s1895_s4 = inlined_call_operand.hbm [shape: bf16[3,128,128], index: 4, kind: input, shape index: {}]   ;;  %s1896_s5 = inlined_call_operand.vmem [shape: f32[1,128], index: 5, kind: input, shape index: {}]   ;;  %s1897_s6 = inlined_call_operand.vmem [shape: f32[1,128], index: 6, kind: input, shape index: {}]   ;;  %s1898_s7 = inlined_call_operand.hbm [shape: f32[2,16,128], index: 7, kind: output, shape index: {}]  }
   0x1   :  { %1905 = sst [smem:[#allocation12_spill]] %s1892_s1 }
   0x2   :  { %12 = vsyncpa [#allocation3], 0 }
   0x3   :  { %14 = vsyncpa [#allocation3 + $0x1], 0 }
   0x4   :  { %15 = vsyncpa [#allocation6], 0 }
   0x5   :  { %16 = vsyncpa [#allocation4], 0 }
   0x6   :  { %18 = vsyncpa [#allocation4 + $0x1], 0  ;;  %s1594_s24 = smov 0   ;;  %s1596_s25 = smov 0  }
   0x7   :  { %s1598_s26 = smov 0   ;;  %s1600_s27 = smov 0  }
   0x8 LB: > { %s1615_s28 = sadd.s32 4294967295, %s1542_s27   ;;  %s1082_s29 = sadd.s32 4294967294, %s1542_s27   ;;  %s1542_s27 = sphi %s1600_s27, %s1925_s27   ;;  %s1538_s26 = sphi %s1598_s26, %s1924_s26   ;;  %s1534_s25 = sphi %s1596_s25, %s1923_s25   ;;  %s1530_s24 = sphi %s1594_s24, %s1922_s24  }
   0x9   : > { %p44_p0 = scmp.ne.s32.totalorder %s1534_s25, %s1530_s24  ;;  %p1900_p1 = scmp.eq.s32.totalorder %s1615_s28, 0 }
   0xa   : > { %p194_p2 = scmp.eq.s32.totalorder %s1615_s28, 1  ;;  %p200_p3 = scmp.eq.s32.totalorder %s1082_s29, 1 }
   0xb   : > { %p1624_p4 = por %p1900_p1, %p44_p0  ;;  %p1083_p5 = scmp.ge.s32.totalorder %s1542_s27, 1 }
   0xc   : > { %p1629_p6 = por %p200_p3, %p44_p0  ;;  %p207_p7 = scmp.lt.s32.totalorder %s1542_s27, 3 }
   0xd   : > { %s1906_s30 = scalar_select %p1624_p4, 1, 0 }
   0xe   : > { %s1907_s8 = scalar_select %p1629_p6, 1, 0 }
   0xf   : > { %p1634_p8 = pnand %p1083_p5, %p207_p7  ;;  %s1544_s10 = smov [#allocation5]  }
  0x10   : > { %s219_s11 = sshll.u32 %s1544_s10, 4  ;;  %s1545_s13 = smov [#allocation7]   ;;  %s220_s11 = int_to_ptr.vmem [resolvable:$true] %s219_s11 }
  0x11   : > { %s1908_s9 = scalar_select %p1634_p8, 1, 0 }
  0x12   : > { %p1296_p9 = pneg %p1634_p8  ;;  %s238_s14 = sshll.u32 %s1545_s13, 4  ;;  %s239_s14 = int_to_ptr.vmem [resolvable:$true] %s238_s14 }
  0x13   : > { %s1405_s15 = scalar_lea.vmem %s220_s11, 1536  ;;  %p1413_p5 = scmp.lt.s32.totalorder %s220_s11, %s220_s11 }
  0x14   : > { %p1643_p11 = pnand %p1296_p9, %p1900_p1  ;;  %p1406_p13 = scmp.ne.s32.totalorder %s220_s11, %s1405_s15 }
  0x15   : > { %p1414_p7 = scmp.lt.s32.totalorder %s1405_s15, %s1405_s15 }
  0x16   : > { %p1396_p12 = pneg %p1643_p11 }
  0x17   : > { %p1415_p10 = por %p1414_p7, %p1413_p5 }
  0x18   : > { %p1408_p0 = pnand %p1406_p13, %p1396_p12 }
  0x1a   : > { %p1409_p3 = pneg %p1408_p0 }
  0x1c   : > { %p1416_p9 = pnand %p1415_p10, %p1409_p3 }
  0x1e   : > { %1419 = shalt.err (!%p1416_p9)
}
  0x1f   : > { %s1899_s16 = smov 64   ;;  %s1901_s17 = smov 4  }
  0x20   : > { %s1910_s1 = sld [smem:[#allocation12_spill]]  ;;  %s1431_s20 = scalar_lea.vmem %s239_s14, 3072 }
  0x21   : > { %p1432_p13 = scmp.ne.s32.totalorder %s239_s14, %s1431_s20  ;;  %p1439_p10 = scmp.lt.s32.totalorder %s239_s14, %s239_s14 }
  0x22   : > { %p1440_p3 = scmp.lt.s32.totalorder %s1431_s20, %s1431_s20 }
  0x23   : > { %p1434_p0 = pnand %p1432_p13, %p1396_p12 }
  0x24   : > { %p1441_p7 = por %p1440_p3, %p1439_p10 }
  0x25   : > { %p1435_p5 = pneg %p1434_p0 }
  0x26   : > { %1299 = dma.hbm_to_vmem [thread:$0]  (!%p1643_p11), %s1910_s1, 1536, %s220_s11, [#allocation6], %s1899_s16, %s1899_s16, %s1901_s17  }
  0x27   : > { %p1442_p9 = pnand %p1441_p7, %p1435_p5 }
  0x29   : > { %1445 = shalt.err (!%p1442_p9)
}
  0x2a   : > { %1302 = dma.hbm_to_vmem [thread:$0]  (!%p1643_p11), %s1895_s4, 3072, %s239_s14, [#allocation6], %s1899_s16, %s1899_s16, %s1901_s17  }
  0x2b   : > { %s1672_s23 = sadd.s32 1, %s1542_s27   ;;  %s31_s29 = sadd.s32 1, %s1538_s26 }
  0x2c   : > { %s28_s10 = ssub.s32 %s1542_s27, %s1672_s23  ;;  %p38_p12 = scmp.ne.s32.totalorder %s1538_s26, %s1534_s25 }
  0x2d   : > { %p29_p13 = scmp.eq.s32.totalorder %s28_s10, 0  ;;  %p39_p0 = scmp.eq.s32.totalorder %s1542_s27, 0 }
  0x2e   : > { %p1682_p5 = por %p194_p2, %p38_p12  ;;  %p1313_p10 = scmp.lt.s32.totalorder %s1542_s27, 2 }
  0x2f   : > { %s1688_s12 = scalar_select %p29_p13, %s1538_s26, %s31_s29  }
  0x30   : > { %s1911_s11 = scalar_select %p1682_p5, 1, 0 }
  0x31   : > { %p40_p3 = por %p39_p0, %p38_p12  ;;  %s258_s13 = sand.u32 1, %s1538_s26  }
  0x32   : > { %s1087_s15 = sshll.u32 %s258_s13, 3  ;;  %s1144_s14 = sshll.u32 %s1542_s27, 7 }
  0x33   : > { %s1695_s20 = scalar_lea.hbm %s1891_s0, %s1144_s14  ;;  %s262_s21 = scalar_lea.vmem [#allocation2], %s1087_s15 }
  0x34   : > { %s269_s22 = sshll.u32 %s262_s21, 4  ;;  %p1699_p2 = pnand %p1313_p10, %p40_p3  ;;  %s1697_s22 = int_to_ptr.vmem [resolvable:$true] %s269_s22 }
  0x35   : > { %s1703_s29 = scalar_lea.sflag [#allocation3], %s258_s13  ;;  %s1446_s16 = scalar_lea.hbm %s1695_s20, 128 }
  0x36   : > { %p1447_p11 = scmp.ne.s32.totalorder %s1695_s20, %s1446_s16  ;;  %p1448_p7 = pneg %p1699_p2 }
  0x37   : > { %s1451_s15 = scalar_lea.hbm %s1891_s0, 256  ;;  %p1452_p13 = scmp.lt.s32.totalorder %s1695_s20, %s1891_s0 }
  0x38   : > { %p1449_p9 = pnand %p1448_p7, %p1447_p11  ;;  %p1453_p0 = scmp.lt.s32.totalorder %s1451_s15, %s1446_s16 }
  0x3a   : > { %p1450_p12 = pneg %p1449_p9  ;;  %p1454_p10 = por %p1453_p0, %p1452_p13 }
  0x3c   : > { %p1455_p3 = pnand %p1454_p10, %p1450_p12 }
  0x3e   : > { %1458 = shalt.err (!%p1455_p3)
}
  0x3f   : > { %s1459_s13 = scalar_lea.vmem %s1697_s22, 128  ;;  %s1548_s17 = smov [#allocation2]  }
  0x40   : > { %p1460_p1 = scmp.ne.s32.totalorder %s1697_s22, %s1459_s13  ;;  %s1464_s1 = sshll.u32 %s1548_s17, 4  ;;  %s1465_s1 = int_to_ptr.vmem [resolvable:$false] %s1464_s1 }
  0x41   : > { %s1466_s14 = scalar_lea.vmem %s1465_s1, 256  ;;  %p1467_p9 = scmp.lt.s32.totalorder %s1697_s22, %s1465_s1 }
  0x42   : > { %p1462_p6 = pnand %p1460_p1, %p1448_p7  ;;  %p1468_p5 = scmp.lt.s32.totalorder %s1466_s14, %s1459_s13 }
  0x44   : > { %p1463_p11 = pneg %p1462_p6  ;;  %p1469_p4 = por %p1468_p5, %p1467_p9 }
  0x46   : > { %p1470_p8 = pnand %p1469_p4, %p1463_p11 }
  0x48   : > { %1473 = shalt.err (!%p1470_p8)
}
  0x49   : > { %s1913_s16 = smov 4   ;;  %s1914_s18 = smov 64  }
  0x4a   : > { %1306 = dma.hbm_to_vmem [thread:$0]  (!%p1699_p2), %s1695_s20, 128, %s1697_s22, %s1703_s29, %s1914_s18, %s1914_s18, %s1913_s16  }
  0x4b   : > { %p1915_p1 = scmp.ne.s32.totalorder %s1908_s9, 0 }
  0x4c   : > { %s1730_s17 = sand.u32 (!%p1915_p1), 1, %s1534_s25   ;;  %p1916_p4 = scmp.ne.s32.totalorder (!%p1915_p1), %s1906_s30, 0 }
  0x4d   : > { %281 = sbr.rel (%p1915_p1) target bundleno = 586 (0x24a), region = 48  ;;  %s1091_s1 = sshll.u32 (!%p1915_p1), %s1730_s17, 3 }
  0x4e   : > { %s284_s15 = scalar_lea.sflag (!%p1915_p1), [#allocation3], %s1730_s17  ;;  %s287_s19 = scalar_lea.vmem (!%p1915_p1), [#allocation2], %s1091_s1 }
  0x52   : > { %1517 = dma.done.wait (%p1916_p4), %s284_s15, 128  }
  0x53   : > { %1519 = vsyncadd (%p1916_p4), %s284_s15, 4294967168  ;;  %p1917_p6 = scmp.eq.s32.totalorder %s1615_s28, 0 }
  0x55   : > { %1521 = dma.done.wait (%p1917_p6), [#allocation6], 4608   ;;  %p1918_p8 = pmov %p1917_p6 }
  0x56   : > { %v1549_v0 = vmov 0.0   ;;  %vm1550_vm0 = vmmov 0   ;;  %v1357_v1 = vld [vmem:[#allocation5 + $0x18] sm:$0xff]   ;;  %v1359_v3 = vld [vmem:[#allocation5 + $0x10] sm:$0xff]   ;;  %v1361_v5 = vld [vmem:[#allocation5 + $0x8] sm:$0xff]   ;;  %vm366_vm1 = vcmask 523264   ;;  %v413_v35 = vlaneseq }
  0x57   : > { %1523 = vsyncadd (%p1918_p8), [#allocation6], 4294962688  ;;  %1188 = vmatprep.subr.bf16.mxu0 %v1549_v0  ;;  %1200 = vmatprep.subr.bf16.mxu1 %v1549_v0  ;;  %v1358_v2 = vld [vmem:[#allocation5 + $0x38] sm:$0xff]   ;;  %v1360_v4 = vld [vmem:[#allocation5 + $0x30] sm:$0xff]   ;;  %s1094_s10 = sshll.u32 %s1730_s17, 4  ;;  %s1145_s16 = sshll.u32 %s1615_s28, 8 }
  0x58   : > { %1196 = vmatprep.mubr.msk.bf16.mxu0 %vm1550_vm0, %v1549_v0  ;;  %1208 = vmatprep.mubr.msk.bf16.mxu1 %vm1550_vm0, %v1549_v0  ;;  %v1362_v6 = vld [vmem:[#allocation5 + $0x28] sm:$0xff]   ;;  %v1363_v7 = vld [vmem:[#allocation5] sm:$0xff]   ;;  %v1364_v8 = vld [vmem:[%s287_s19] sm:$0xff]   ;;  %v1784_v39 = vshrl.u32 %v413_v35, 7  ;;  %s325_s18 = scalar_lea.vmem [#allocation8], %s1094_s10  ;;  %s1846_s30 = scalar_lea.hbm %s1898_s7, %s1145_s16 }
  0x59   : > { %1189 = vmatpush3.bf16.msra.mxu0 %v1357_v1  ;;  %1201 = vmatpush3.bf16.msra.mxu1 %v1358_v2  ;;  %v1365_v9 = vld [vmem:[#allocation5 + $0x20] sm:$0xff]   ;;  %v1366_v10 = vld [vmem:[#allocation5 + $0x58] sm:$0xff]   ;;  %v1367_v11 = vld [vmem:[#allocation5 + $0x50] sm:$0xff]   ;;  %s990_s1 = sshll.u32 %s325_s18, 4  ;;  %s977_s9 = scalar_lea.sflag [#allocation4], %s1730_s17  ;;  %s1848_s1 = int_to_ptr.vmem [resolvable:$true] %s990_s1 }
  0x5a   : > { %1190 = vmatprep.subr.bf16.mxu0 %v1549_v0  ;;  %1202 = vmatprep.subr.bf16.mxu1 %v1549_v0  ;;  %v1368_v12 = vld [vmem:[#allocation5 + $0x48] sm:$0xff]   ;;  %v1369_v13 = vld [vmem:[#allocation5 + $0x40] sm:$0xff]   ;;  %v1370_v14 = vld [vmem:[#allocation7 + $0x38] sm:$0xff]   ;;  %v1787_v41 = vadd.s32 4294967295, %v1784_v39  ;;  %vm415_vm2 = vcmp.lt.s32.totalorder %v1784_v39, 1  ;;  %v418_v42 = vadd.s32 8, %v1784_v39 }
  0x5b   : > { %v1371_v15 = vld [vmem:[#allocation7 + $0x78] sm:$0xff]   ;;  %v1372_v16 = vld [vmem:[#allocation7 + $0x30] sm:$0xff]   ;;  %v1374_v18 = vld [vmem:[#allocation7 + $0x28] sm:$0xff]   ;;  %vm583_vm4 = vcmp.lt.s32.totalorder %v1784_v39, 7  ;;  %s1474_s28 = scalar_lea.vmem %s1848_s1, 256  ;;  %p1919_p2 = scmp.ne.s32.totalorder %s1911_s11, 0 }
  0x5c   : > { %v1373_v17 = vld [vmem:[#allocation7 + $0x70] sm:$0xff]   ;;  %v1375_v19 = vld [vmem:[#allocation7 + $0x68] sm:$0xff]   ;;  %v1376_v20 = vld [vmem:[#allocation7 + $0x20] sm:$0xff]   ;;  %vm421_vm3 = vcmp.ge.s32.totalorder %v1787_v41, 0  ;;  %v1794_v46 = vadd.s32 1, %v418_v42  ;;  %p1475_p5 = scmp.ne.s32.totalorder %s1848_s1, %s1474_s28  ;;  %s1551_s20 = smov [#allocation8]  }
  0x5d   : > { %1191 = vmatpush3.bf16.msra.mxu0 %v1359_v3  ;;  %1203 = vmatpush3.bf16.msra.mxu1 %v1360_v4  ;;  %v1377_v21 = vld [vmem:[#allocation7 + $0x60] sm:$0xff]   ;;  %v1378_v22 = vld [vmem:[#allocation7 + $0x18] sm:$0xff]   ;;  %v1380_v24 = vld [vmem:[#allocation7 + $0x10] sm:$0xff]   ;;  %s1478_s22 = sshll.u32 %s1551_s20, 4  ;;  %s1479_s22 = int_to_ptr.vmem [resolvable:$false] %s1478_s22 }
  0x5e   : > { %1192 = vmatprep.subr.bf16.mxu0 %v1549_v0  ;;  %1204 = vmatprep.subr.bf16.mxu1 %v1549_v0  ;;  %v1379_v23 = vld [vmem:[#allocation7 + $0x58] sm:$0xff]   ;;  %v1381_v25 = vld [vmem:[#allocation7 + $0x50] sm:$0xff]   ;;  %v1382_v26 = vld [vmem:[#allocation7 + $0x8] sm:$0xff]   ;;  %vm591_vm5 = vcmp.lt.s32.totalorder %v1794_v46, 16  ;;  %p1476_p7 = pnand %p1475_p5, %p1919_p2  ;;  %s1480_s10 = scalar_lea.vmem %s1479_s22, 512 }
  0x5f   : > { %v1383_v27 = vld [vmem:[#allocation7 + $0x48] sm:$0xff]   ;;  %v1384_v28 = vld [vmem:[#allocation7] sm:$0xff]   ;;  %v1111_v58 = vld [vmem:[%s1893_s2] ss:$0 sm:$0xff]  ;;  %p1481_p13 = scmp.lt.s32.totalorder %s1848_s1, %s1479_s22  ;;  %p1482_p0 = scmp.lt.s32.totalorder %s1480_s10, %s1474_s28 }
  0x60   : > { %v1385_v29 = vld [vmem:[#allocation7 + $0x40] sm:$0xff]   ;;  %v1112_v62 = vld [vmem:[%s1894_s3] ss:$0 sm:$0xff]  ;;  %p1477_p12 = pneg %p1476_p7 }
  0x61   : > { %1193 = vmatpush3.bf16.msra.mxu0 %v1361_v5  ;;  %1205 = vmatpush3.bf16.msra.mxu1 %v1362_v6  ;;  %v1386_v6 = vld [vmem:[#allocation7 + $0xb8] sm:$0xff]   ;;  %v1138_v42 = vld [vmem:[%s1897_s6] ss:$0 sm:$0xff]  ;;  %p1483_p10 = por %p1482_p0, %p1481_p13 }
  0x62   : > { %1194 = vmatprep.subr.bf16.mxu0 %v1549_v0  ;;  %1206 = vmatprep.subr.bf16.mxu1 %v1549_v0 }
  0x63   : > { %p1484_p3 = pnand %p1483_p10, %p1477_p12 }
  0x65   : > { %1195 = vmatpush3.bf16.msra.mxu0 %v1363_v7  ;;  %1207 = vmatpush3.bf16.msra.mxu1 %v1365_v9  ;;  %v1388_v9 = vld [vmem:[#allocation7 + $0xa8] sm:$0xff]  }
  0x66   : > { %1212 = vmatprep.subr.bf16.mxu0 %v1549_v0  ;;  %1224 = vmatprep.subr.bf16.mxu1 %v1549_v0 }
  0x68   : > { %1197 = vmatmul.mubr.msk.bf16.vlgmr.msra.gmra.mxu0 %vm366_vm1, %v1364_v8  ;;  %1209 = vmatmul.mubr.msk.bf16.vlgmr.msra.gmra.mxu1 %vm366_vm1, %v1364_v8 }
  0x69   : > { %1213 = vmatpush3.bf16.msra.mxu0 %v1366_v10  ;;  %1220 = vmatprep.mubr.msk.bf16.mxu0 %vm1550_vm0, %v1549_v0  ;;  %v1389_v10 = vld [vmem:[#allocation7 + $0xa0] sm:$0xff]  }
  0x6a   : > { %1214 = vmatprep.subr.bf16.mxu0 %v1549_v0  ;;  %1240 = vmatprep.mubr.msk.bf16.mxu1 %vm1550_vm0, %v1549_v0 }
  0x6b   : > { %1225 = vmatpush3.bf16.msra.mxu1 %v1370_v14  ;;  %v1393_v14 = vld [vmem:[#allocation7 + $0x80] sm:$0xff]  }
  0x6c   : > { %1226 = vmatprep.subr.bf16.mxu1 %v1549_v0 }
  0x6d   : > { %1215 = vmatpush3.bf16.msra.mxu0 %v1367_v11  ;;  %v1390_v11 = vld [vmem:[#allocation7 + $0x98] sm:$0xff]  }
  0x6e   : > { %1216 = vmatprep.subr.bf16.mxu0 %v1549_v0 }
  0x6f   : > { %1227 = vmatpush3.bf16.msra.mxu1 %v1372_v16 }
  0x70   : > { %1228 = vmatprep.subr.bf16.mxu1 %v1549_v0 }
  0x71   : > { %1217 = vmatpush3.bf16.msra.mxu0 %v1368_v12  ;;  %v1391_v12 = vld [vmem:[#allocation7 + $0x90] sm:$0xff]  }
  0x72   : > { %1218 = vmatprep.subr.bf16.mxu0 %v1549_v0 }
  0x73   : > { %1229 = vmatpush3.bf16.msra.mxu1 %v1374_v18 }
  0x74   : > { %1230 = vmatprep.subr.bf16.mxu1 %v1549_v0 }
  0x75   : > { %1219 = vmatpush3.bf16.msra.mxu0 %v1369_v13  ;;  %v1392_v13 = vld [vmem:[#allocation7 + $0x88] sm:$0xff]  }
  0x76   : > { %1244 = vmatprep.subr.bf16.mxu0 %v1549_v0 }
  0x77   : > { %1231 = vmatpush3.bf16.msra.mxu1 %v1376_v20 }
  0x78   : > { %1221 = vmatmul.mubr.msk.bf16.vlgmr.msra.gmra.mxu0 %vm366_vm1, %v1364_v8  ;;  %1232 = vmatprep.subr.bf16.mxu1 %v1549_v0  ;;  %v1387_v8 = vld [vmem:[#allocation7 + $0xb0] sm:$0xff]  }
  0x79   : > { %1260 = vmatprep.mubr.msk.bf16.mxu0 %vm1550_vm0, %v1549_v0  ;;  %1245 = vmatpush3.bf16.msra.mxu0 %v1371_v15 }
  0x7a   : > { %1246 = vmatprep.subr.bf16.mxu0 %v1549_v0 }
  0x7b   : > { %1233 = vmatpush3.bf16.msra.mxu1 %v1378_v22 }
  0x7c   : > { %1234 = vmatprep.subr.bf16.mxu1 %v1549_v0 }
  0x7d   : > { %1247 = vmatpush3.bf16.msra.mxu0 %v1373_v17 }
  0x7e   : > { %1248 = vmatprep.subr.bf16.mxu0 %v1549_v0 }
  0x7f   : > { %1235 = vmatpush3.bf16.msra.mxu1 %v1380_v24 }
  0x80   : > { %1236 = vmatprep.subr.bf16.mxu1 %v1549_v0 }
  0x81   : > { %1249 = vmatpush3.bf16.msra.mxu0 %v1375_v19 }
  0x82   : > { %1250 = vmatprep.subr.bf16.mxu0 %v1549_v0 }
  0x83   : > { %1237 = vmatpush3.bf16.msra.mxu1 %v1382_v26 }
  0x84   : > { %1238 = vmatprep.subr.bf16.mxu1 %v1549_v0 }
  0x85   : > { %1251 = vmatpush3.bf16.msra.mxu0 %v1377_v21 }
  0x86   : > { %1252 = vmatprep.subr.bf16.mxu0 %v1549_v0 }
  0x87   : > { %1239 = vmatpush3.bf16.msra.mxu1 %v1384_v28 }
  0x88   : > { %1264 = vmatprep.subr.bf16.mxu1 %v1549_v0 }
  0x89   : > { %1253 = vmatpush3.bf16.msra.mxu0 %v1379_v23 }
  0x8a   : > { %1254 = vmatprep.subr.bf16.mxu0 %v1549_v0 }
  0x8d   : > { %1255 = vmatpush3.bf16.msra.mxu0 %v1381_v25 }
  0x8e   : > { %1256 = vmatprep.subr.bf16.mxu0 %v1549_v0 }
  0x91   : > { %1257 = vmatpush3.bf16.msra.mxu0 %v1383_v27 }
  0x92   : > { %1258 = vmatprep.subr.bf16.mxu0 %v1549_v0 }
  0x95   : > { %1259 = vmatpush3.bf16.msra.mxu0 %v1385_v29 }
 0x128   : > { %v404_v30 = vpop.f32.mrf.mxu0  ;;  %v498_v31 = vpop.f32.mrf.mxu1 }
 0x129   : > { %v411_v43 = vrot.slane %v404_v30, 7 }
 0x12a   : > { %v1198_v32 = vpop.f32.mrf.mxu0  ;;  %v1210_v33 = vpop.f32.mrf.mxu1 }
 0x12c   : > { %v407_v34 = vpop.f32.mrf.mxu0  ;;  %v501_v36 = vpop.f32.mrf.mxu1 }
 0x12d   : > { %v412_v40 = vrot.slane %v407_v34, 7 }
 0x12e   : > { %v1199_v37 = vpop.f32.mrf.mxu0  ;;  %v1211_v38 = vpop.f32.mrf.mxu1 }
 0x12f   : > { %v417_v44 = vsel %vm415_vm2, %v412_v40, %v411_v43  ;;  %v416_v49 = vsel %vm415_vm2, %v411_v43, %v412_v40  ;;  %v1137_v37 = vld [vmem:[%s1896_s5] ss:$0 sm:$0xff] }
 0x130   : > { %v427_v48 = vsel %vm421_vm3, %v417_v44, 0.0  ;;  %v506_v55 = vadd.f32 %v501_v36, %v416_v49 }
 0x131   : > { %v505_v53 = vadd.f32 %v498_v31, %v427_v48 }
 0x138   : > { %v574_v45 = vpop.f32.mrf.mxu0 }
 0x139   : > { %v581_v51 = vrot.slane %v574_v45, 1 }
 0x13a   : > { %v1222_v47 = vpop.f32.mrf.mxu0 }
 0x13c   : > { %v577_v50 = vpop.f32.mrf.mxu0 }
 0x13d   : > { %v582_v52 = vrot.slane %v577_v50, 1 }
 0x13e   : > { %v1223_v54 = vpop.f32.mrf.mxu0 }
 0x13f   : > { %v584_v56 = vsel %vm583_vm4, %v581_v51, %v582_v52  ;;  %v585_v57 = vsel %vm583_vm4, %v582_v52, %v581_v51 }
 0x140   : > { %v595_v59 = vsel %vm591_vm5, %v585_v57, 0.0  ;;  %v596_v60 = vadd.f32 %v584_v56, %v505_v53 }
 0x141   : > { %v597_v61 = vadd.f32 %v595_v59, %v506_v55 }
 0x142   : > { %v605_v63 = vmul.f32 %v1111_v58, %v596_v60 }
 0x143   : > { %v606_v1 = vmul.f32 %v1111_v58, %v597_v61 }
 0x144   : > { %v614_v2 = vadd.f32 %v1112_v62, %v605_v63 }
 0x145   : > { %v615_v3 = vadd.f32 %v1112_v62, %v606_v1 }
 0x146   : > { %v616_v4 = vmax.f32 %v614_v2, 0.0 }
 0x147   : > { %v617_v5 = vmax.f32 %v615_v3, 0.0 }
 0x149   : > { %v618_v7 = vpack.c.bf16 %v617_v5, %v616_v4 }
 0x14b   : > { %1241 = vmatmul.mubr.bf16.vlgmr.msra.gmra.mxu1 %v618_v7  ;;  %1261 = vmatmul.mubr.bf16.vlgmr.msra.gmra.mxu0 %v618_v7 }
 0x14c   : > { %1265 = vmatpush3.bf16.msra.mxu1 %v1386_v6  ;;  %1280 = vmatprep.mubr.msk.bf16.mxu1 %vm1550_vm0, %v1549_v0 }
 0x14d   : > { %1266 = vmatprep.subr.bf16.mxu1 %v1549_v0 }
 0x150   : > { %1267 = vmatpush3.bf16.msra.mxu1 %v1387_v8 }
 0x151   : > { %1268 = vmatprep.subr.bf16.mxu1 %v1549_v0 }
 0x154   : > { %1269 = vmatpush3.bf16.msra.mxu1 %v1388_v9 }
 0x155   : > { %1270 = vmatprep.subr.bf16.mxu1 %v1549_v0 }
 0x158   : > { %1271 = vmatpush3.bf16.msra.mxu1 %v1389_v10 }
 0x159   : > { %1272 = vmatprep.subr.bf16.mxu1 %v1549_v0 }
 0x15c   : > { %1273 = vmatpush3.bf16.msra.mxu1 %v1390_v11 }
 0x15d   : > { %1274 = vmatprep.subr.bf16.mxu1 %v1549_v0 }
 0x160   : > { %1275 = vmatpush3.bf16.msra.mxu1 %v1391_v12 }
 0x161   : > { %1276 = vmatprep.subr.bf16.mxu1 %v1549_v0 }
 0x164   : > { %1277 = vmatpush3.bf16.msra.mxu1 %v1392_v13 }
 0x165   : > { %1278 = vmatprep.subr.bf16.mxu1 %v1549_v0 }
 0x168   : > { %1279 = vmatpush3.bf16.msra.mxu1 %v1393_v14 }
 0x16b   : > { %1281 = vmatmul.mubr.bf16.vlgmr.msra.gmra.mxu1 %v618_v7 }
 0x20b   : > { %v717_v15 = vpop.f32.mrf.mxu1  ;;  %v831_v16 = vpop.f32.mrf.mxu0 }
 0x20c   : > { %v724_v24 = vrot.slane %v717_v15, 7 }
 0x20d   : > { %v1242_v17 = vpop.f32.mrf.mxu1  ;;  %v1262_v18 = vpop.f32.mrf.mxu0 }
 0x20f   : > { %v720_v19 = vpop.f32.mrf.mxu1  ;;  %v834_v20 = vpop.f32.mrf.mxu0 }
 0x210   : > { %v725_v23 = vrot.slane %v720_v19, 7 }
 0x211   : > { %v1243_v21 = vpop.f32.mrf.mxu1  ;;  %v1263_v22 = vpop.f32.mrf.mxu0 }
 0x212   : > { %v727_v25 = vsel %vm415_vm2, %v725_v23, %v724_v24  ;;  %v726_v28 = vsel %vm415_vm2, %v724_v24, %v725_v23 }
 0x213   : > { %v728_v0 = vsel %vm421_vm3, %v727_v25, 0.0  ;;  %v839_v34 = vadd.f32 %v834_v20, %v726_v28 }
 0x214   : > { %v838_v32 = vadd.f32 %v831_v16, %v728_v0 }
 0x22b   : > { %v939_v26 = vpop.f32.mrf.mxu1 }
 0x22c   : > { %v946_v30 = vrot.slane %v939_v26, 1 }
 0x22d   : > { %v1282_v27 = vpop.f32.mrf.mxu1 }
 0x22f   : > { %v942_v29 = vpop.f32.mrf.mxu1 }
 0x230   : > { %v947_v31 = vrot.slane %v942_v29, 1 }
 0x231   : > { %v1283_v33 = vpop.f32.mrf.mxu1 }
 0x232   : > { %v948_v35 = vsel %vm583_vm4, %v946_v30, %v947_v31  ;;  %v949_v36 = vsel %vm583_vm4, %v947_v31, %v946_v30 }
 0x233   : > { %v951_v38 = vsel %vm591_vm5, %v949_v36, 0.0  ;;  %v952_v40 = vadd.f32 %v948_v35, %v838_v32 }
 0x234   : > { %v953_v41 = vadd.f32 %v951_v38, %v839_v34 }
 0x235   : > { %v961_v43 = vmul.f32 %v1137_v37, %v952_v40 }
 0x236   : > { %v962_v44 = vmul.f32 %v1137_v37, %v953_v41 }
 0x237   : > { %v970_v39 = vadd.f32 %v1138_v42, %v961_v43 }
 0x238   : > { %v971_v45 = vadd.f32 %v1138_v42, %v962_v44 }
 0x239   : > { %v972_v47 = vmax.f32 %v970_v39, 0.0 }
 0x23a   : > { %v973_v46 = vmax.f32 %v971_v45, 0.0 }
 0x23b   : > { %974 = vst [vmem:[%s325_s18] sm:$0xff] %v972_v47 }
 0x23c   : > { %975 = vst [vmem:[%s325_s18 + $0x8] sm:$0xff] %v973_v46 }
 0x23d   : > { %1487 = shalt.err (!%p1484_p3)
}
 0x23e   : > { %s1488_s29 = scalar_lea.hbm %s1846_s30, 256  ;;  %s1492_s14 = scalar_lea.hbm %s1898_s7, 512 }
 0x23f   : > { %p1489_p11 = scmp.ne.s32.totalorder %s1846_s30, %s1488_s29  ;;  %p1493_p4 = scmp.lt.s32.totalorder %s1846_s30, %s1898_s7 }
 0x240   : > { %p1494_p6 = scmp.lt.s32.totalorder %s1492_s14, %s1488_s29 }
 0x241   : > { %p1490_p9 = pnand %p1489_p11, %p1919_p2 }
 0x242   : > { %p1495_p8 = por %p1494_p6, %p1493_p4 }
 0x243   : > { %p1491_p1 = pneg %p1490_p9 }
 0x245   : > { %p1496_p5 = pnand %p1495_p8, %p1491_p1 }
 0x247   : > { %1499 = shalt.err (!%p1496_p5)
}
 0x248   : > { %s1552_s15 = smov 128   ;;  %s1553_s19 = smov 8  }
 0x249   : > { %1294 = dma.vmem_to_hbm [thread:$0]  (%p1919_p2), %s1848_s1, 256, %s1846_s30, %s977_s9, %s1552_s15, %s1552_s15, %s1553_s19  }
 0x24a PF: > { %s1005_s28 = sand.u32 1, %s1530_s24   ;;  %p1920_p7 = scmp.ne.s32.totalorder %s1907_s8, 0 }
 0x24b   : > { %p1921_p12 = scmp.ge.s32.totalorder %s1542_s27, 2  ;;  %s1006_s20 = scalar_lea.sflag [#allocation4], %s1005_s28 }
 0x24d   : > { %p1308_p13 = pnand %p1921_p12, %p1920_p7 }
 0x24f   : > { %p1309_p0 = pneg %p1308_p13 }
 0x251   : > { %1525 = dma.done.wait (%p1309_p0), %s1006_s20, 256  }
 0x252   : > { %1527 = vsyncadd (%p1309_p0), %s1006_s20, 4294967040  ;;  %p21_p10 = scmp.ge.s32.totalorder %s1672_s23, 4   ;;  %s1922_s24 = smov %s1534_s25 }
 0x253   : > { %s1923_s25 = smov %s1538_s26  ;;  %s1924_s26 = smov %s1688_s12 }
 0x254   : > { %s1925_s27 = smov %s1672_s23  ;;  %23 = sbr.rel (!%p21_p10) target bundleno = 8 (0x8), region = 105 }
 0x259   :  { %1011 = vsyncpa [#allocation3], 1 }
 0x25a   :  { %1013 = vsyncpa [#allocation3 + $0x1], 1 }
 0x25b   :  { %1014 = vsyncpa [#allocation6], 1 }
 0x25c   :  { %1015 = vsyncpa [#allocation4], 1 }
 0x25d   :  { %1017 = vsyncpa [#allocation4 + $0x1], 1 }

</bundles_post_ra>
